<compile_context>
chip_gen: v6e
topology: v6e:2x2x1
jax: 0.10.0
libtpu: 0.0.40
codegen_flags: <defaults>
</compile_context>

<pallas_src>
import math
import jax
import jax.numpy as jnp
from jax.experimental import pallas as pl
from jax.experimental.pallas import tpu as pltpu


def _ffn_kernel(x_ref, w1_ref, b1_ref, w2_ref, b2_ref, o_ref, acc_ref):
    # x_ref  : (tm, d_model)   row tile               (native dtype)
    # w1_ref : (d_model, tf)   column tile of W1      (native dtype)
    # b1_ref : (1, tf)         matching slice of b1
    # w2_ref : (tf, d_model)   row tile of W2         (native dtype)
    # b2_ref : (1, d_model)    full b2
    # o_ref  : (tm, d_model)   output row tile (same block across the d_ff axis)
    # acc_ref: (tm, d_model)   f32 accumulator scratch
    j = pl.program_id(1)

    @pl.when(j == 0)
    def _():
        acc_ref[...] = jnp.zeros_like(acc_ref)

    # First matmul on native-dtype operands, f32 accumulate; ReLU is elementwise so it is
    # correct per d_ff tile.
    h = jnp.dot(x_ref[...], w1_ref[...], preferred_element_type=jnp.float32)
    h = jnp.maximum(h + b1_ref[...].astype(jnp.float32), 0.0)
    # TODO(synk): dropout is identity in eval mode; training-time dropout (p=0.1) would use
    #             pltpu.prng_seed + pltpu.stateful_bernoulli on h and rescale by 1/(1-p).

    # Second matmul: accumulate partial (tm, d_model) contribution of this d_ff tile.
    acc_ref[...] += jnp.dot(h.astype(w2_ref.dtype), w2_ref[...],
                            preferred_element_type=jnp.float32)

    @pl.when(j == pl.num_programs(1) - 1)
    def _():
        # b2 added exactly once, after the full d_ff reduction; store in the output dtype.
        o_ref[...] = (acc_ref[...] + b2_ref[...].astype(jnp.float32)).astype(o_ref.dtype)


def position_wise_feed_forward(x, w1, b1, w2, b2, *, tm=256, tf=512):
    """x: (B, S, d_model); w1: (d_model, d_ff); b1: (d_ff,); w2: (d_ff, d_model); b2: (d_model,)."""
    B, S, d_model = x.shape
    d_ff = w1.shape[1]
    rows = B * S

    # d_ff tile: stream W1/W2 in tf-wide slabs; fall back to a single slab if it does not divide.
    tf = min(tf, d_ff)
    if d_ff % tf != 0:
        tf = d_ff

    # Pad row count up to a multiple of tm (padded rows are computed then discarded).
    num_row_tiles = pl.cdiv(rows, tm)
    rows_p = num_row_tiles * tm

    x2d = x.reshape(rows, d_model)
    if rows_p != rows:
        x2d = jnp.pad(x2d, ((0, rows_p - rows), (0, 0)))
    b1_2d = b1.reshape(1, d_ff)
    b2_2d = b2.reshape(1, d_model)

    out2d = pl.pallas_call(
        _ffn_kernel,
        out_shape=jax.ShapeDtypeStruct((rows_p, d_model), x.dtype),
        grid_spec=pltpu.PrefetchScalarGridSpec(
            num_scalar_prefetch=0,
            grid=(num_row_tiles, d_ff // tf),
            in_specs=[
                pl.BlockSpec((tm, d_model), lambda i, j: (i, 0)),    # x row tile
                pl.BlockSpec((d_model, tf), lambda i, j: (0, j)),    # W1 column tile
                pl.BlockSpec((1, tf), lambda i, j: (0, j)),          # b1 slice
                pl.BlockSpec((tf, d_model), lambda i, j: (j, 0)),    # W2 row tile
                pl.BlockSpec((1, d_model), lambda i, j: (0, 0)),     # b2 (full)
            ],
            out_specs=pl.BlockSpec((tm, d_model), lambda i, j: (i, 0)),
            scratch_shapes=[pltpu.VMEM((tm, d_model), jnp.float32)],
        ),
        compiler_params=pltpu.CompilerParams(
            dimension_semantics=("parallel", "arbitrary")),
    )(x2d, w1, b1_2d, w2, b2_2d)

    if rows_p != rows:
        out2d = out2d[:rows]
    return out2d.reshape(B, S, d_model)


def init_params(key, d_model, d_ff, dtype=jnp.float32):
    """Deterministic init mimicking nn.Linear default (uniform +/- 1/sqrt(fan_in))."""
    k1, k2, k3, k4 = jax.random.split(key, 4)
    bound1 = 1.0 / math.sqrt(d_model)
    bound2 = 1.0 / math.sqrt(d_ff)
    # Stored transposed relative to torch (so kernel does x @ W, matching x @ W_torch.T).
    w1 = jax.random.uniform(k1, (d_model, d_ff), dtype, -bound1, bound1)
    b1 = jax.random.uniform(k2, (d_ff,), dtype, -bound1, bound1)
    w2 = jax.random.uniform(k3, (d_ff, d_model), dtype, -bound2, bound2)
    b2 = jax.random.uniform(k4, (d_model,), dtype, -bound2, bound2)
    return w1, b1, w2, b2


if __name__ == "__main__":
    B, S, d_model, d_ff = 2, 8, 32, 64
    key = jax.random.PRNGKey(0)
    kx, kp = jax.random.split(key)
    x = jax.random.normal(kx, (B, S, d_model), jnp.float32)
    w1, b1, w2, b2 = init_params(kp, d_model, d_ff)

    out = position_wise_feed_forward(x, w1, b1, w2, b2)
    out = jax.block_until_ready(out)

    # Pure-JAX reference (eval-mode dropout == identity).
    ref = jnp.maximum(x @ w1 + b1, 0.0) @ w2 + b2
    assert out.shape == (B, S, d_model)
    assert jnp.allclose(out, ref, atol=1e-5, rtol=1e-5)
    print("KERNEL_OK")
</pallas_src>

<mosaic_0001>
module attributes {stable_mosaic.version = 11 : i64} {
  func.func @_ffn_kernel(%arg0: i32, %arg1: i32, %arg2: memref<256x32xf32, #tpu.memory_space<vmem>>, %arg3: memref<32x64xf32, #tpu.memory_space<vmem>>, %arg4: memref<1x64xf32, #tpu.memory_space<vmem>>, %arg5: memref<64x32xf32, #tpu.memory_space<vmem>>, %arg6: memref<1x32xf32, #tpu.memory_space<vmem>>, %arg7: memref<256x32xf32, #tpu.memory_space<vmem>>, %arg8: memref<256x32xf32, #tpu.memory_space<vmem>>) attributes {dimension_semantics = [#tpu.dimension_semantics<parallel>, #tpu.dimension_semantics<arbitrary>], iteration_bounds = array<i64: 1, 1>, scalar_prefetch = 0 : i64, scratch_operands = 1 : i64, tpu.core_type = #tpu.core_type<tc>, window_params = [{transform_indices = @transform_0, window_bounds = array<i64: 256, 32>}, {transform_indices = @transform_1, window_bounds = array<i64: 32, 64>}, {transform_indices = @transform_2, window_bounds = array<i64: 1, 64>}, {transform_indices = @transform_3, window_bounds = array<i64: 64, 32>}, {pipeline_mode = #tpu.pipeline_mode<synchronous>, transform_indices = @transform_4, window_bounds = array<i64: 1, 32>}, {transform_indices = @transform_5, window_bounds = array<i64: 256, 32>}]} {
    %c0_i32 = arith.constant 0 : i32
    %0 = arith.cmpi eq, %arg1, %c0_i32 : i32
    %1 = arith.extui %0 : i1 to i32
    %c0_i32_0 = arith.constant 0 : i32
    %2 = arith.cmpi ne, %1, %c0_i32_0 : i32
    scf.if %2 {
      %cst_16 = arith.constant 0.000000e+00 : f32
      %19 = vector.broadcast %cst_16 : f32 to vector<256x32xf32>
      %c0_17 = arith.constant 0 : index
      %c0_18 = arith.constant 0 : index
      %20 = vector.load %arg8[%c0_17, %c0_18] : memref<256x32xf32, #tpu.memory_space<vmem>>, vector<256x32xf32>
      tpu.vector_store %arg8[%c0_17, %c0_18], %19 {strides = array<i32>} : memref<256x32xf32, #tpu.memory_space<vmem>>, vector<256x32xf32>,
    } else {
    }
    %c0 = arith.constant 0 : index
    %c0_1 = arith.constant 0 : index
    %3 = vector.load %arg2[%c0, %c0_1] : memref<256x32xf32, #tpu.memory_space<vmem>>, vector<256x32xf32>
    %c0_2 = arith.constant 0 : index
    %c0_3 = arith.constant 0 : index
    %4 = vector.load %arg3[%c0_2, %c0_3] : memref<32x64xf32, #tpu.memory_space<vmem>>, vector<32x64xf32>
    %cst = arith.constant dense<0.000000e+00> : vector<256x64xf32>
    %5 = tpu.matmul %3, %4, %cst {dimension_numbers = #tpu.dot_dimension_numbers<[1], [0], [0], [1], [0, 0, 1, 1], [], []>} : vector<256x32xf32>, vector<32x64xf32>, vector<256x64xf32> -> vector<256x64xf32>
    %c0_4 = arith.constant 0 : index
    %c0_5 = arith.constant 0 : index
    %6 = vector.load %arg4[%c0_4, %c0_5] : memref<1x64xf32, #tpu.memory_space<vmem>>, vector<1x64xf32>
    %7 = vector.broadcast %6 : vector<1x64xf32> to vector<256x64xf32>
    %8 = arith.addf %5, %7 : vector<256x64xf32>
    %cst_6 = arith.constant 0.000000e+00 : f32
    %9 = vector.broadcast %cst_6 : f32 to vector<256x64xf32>
    %10 = arith.maximumf %8, %9 : vector<256x64xf32>
    %c0_7 = arith.constant 0 : index
    %c0_8 = arith.constant 0 : index
    %11 = vector.load %arg8[%c0_7, %c0_8] : memref<256x32xf32, #tpu.memory_space<vmem>>, vector<256x32xf32>
    %c0_9 = arith.constant 0 : index
    %c0_10 = arith.constant 0 : index
    %12 = vector.load %arg5[%c0_9, %c0_10] : memref<64x32xf32, #tpu.memory_space<vmem>>, vector<64x32xf32>
    %cst_11 = arith.constant dense<0.000000e+00> : vector<256x32xf32>
    %13 = tpu.matmul %10, %12, %cst_11 {dimension_numbers = #tpu.dot_dimension_numbers<[1], [0], [0], [1], [0, 0, 1, 1], [], []>} : vector<256x64xf32>, vector<64x32xf32>, vector<256x32xf32> -> vector<256x32xf32>
    %14 = arith.addf %11, %13 : vector<256x32xf32>
    %c0_12 = arith.constant 0 : index
    %c0_13 = arith.constant 0 : index
    %15 = vector.load %arg8[%c0_12, %c0_13] : memref<256x32xf32, #tpu.memory_space<vmem>>, vector<256x32xf32>
    tpu.vector_store %arg8[%c0_12, %c0_13], %14 {strides = array<i32>} : memref<256x32xf32, #tpu.memory_space<vmem>>, vector<256x32xf32>,
    %c0_i32_14 = arith.constant 0 : i32
    %16 = arith.cmpi eq, %arg1, %c0_i32_14 : i32
    %17 = arith.extui %16 : i1 to i32
    %c0_i32_15 = arith.constant 0 : i32
    %18 = arith.cmpi ne, %17, %c0_i32_15 : i32
    scf.if %18 {
      %c0_16 = arith.constant 0 : index
      %c0_17 = arith.constant 0 : index
      %19 = vector.load %arg8[%c0_16, %c0_17] : memref<256x32xf32, #tpu.memory_space<vmem>>, vector<256x32xf32>
      %c0_18 = arith.constant 0 : index
      %c0_19 = arith.constant 0 : index
      %20 = vector.load %arg6[%c0_18, %c0_19] : memref<1x32xf32, #tpu.memory_space<vmem>>, vector<1x32xf32>
      %21 = vector.broadcast %20 : vector<1x32xf32> to vector<256x32xf32>
      %22 = arith.addf %19, %21 : vector<256x32xf32>
      %c0_20 = arith.constant 0 : index
      %c0_21 = arith.constant 0 : index
      %23 = vector.load %arg7[%c0_20, %c0_21] : memref<256x32xf32, #tpu.memory_space<vmem>>, vector<256x32xf32>
      tpu.vector_store %arg7[%c0_20, %c0_21], %22 {strides = array<i32>} : memref<256x32xf32, #tpu.memory_space<vmem>>, vector<256x32xf32>,
    } else {
    }
    return
  }
  func.func @transform_0(%arg0: i32, %arg1: i32) -> (i32, i32) {
    %c0_i32 = arith.constant 0 : i32
    %c0_i32_0 = arith.constant 0 : i32
    return %arg0, %c0_i32 : i32, i32
  }
  func.func @transform_1(%arg0: i32, %arg1: i32) -> (i32, i32) {
    %c0_i32 = arith.constant 0 : i32
    %c0_i32_0 = arith.constant 0 : i32
    return %c0_i32, %arg1 : i32, i32
  }
  func.func @transform_2(%arg0: i32, %arg1: i32) -> (i32, i32) {
    %c0_i32 = arith.constant 0 : i32
    %c0_i32_0 = arith.constant 0 : i32
    return %c0_i32, %arg1 : i32, i32
  }
  func.func @transform_3(%arg0: i32, %arg1: i32) -> (i32, i32) {
    %c0_i32 = arith.constant 0 : i32
    %c0_i32_0 = arith.constant 0 : i32
    return %arg1, %c0_i32 : i32, i32
  }
  func.func @transform_4(%arg0: i32, %arg1: i32) -> (i32, i32) {
    %c0_i32 = arith.constant 0 : i32
    %c0_i32_0 = arith.constant 0 : i32
    %c0_i32_1 = arith.constant 0 : i32
    return %c0_i32, %c0_i32_0 : i32, i32
  }
  func.func @transform_5(%arg0: i32, %arg1: i32) -> (i32, i32) {
    %c0_i32 = arith.constant 0 : i32
    %c0_i32_0 = arith.constant 0 : i32
    return %arg0, %c0_i32 : i32, i32
  }
}

</mosaic_0001>

<bundles_post_ra>
// kernel: tpu_custom_call.1
= control target key start
LH: loop header
LB: loop body
LE: loop exit
PB: predicated region body
PF: predicated region fallthrough
CT: control target
= control target key end

     0   :  { %vm24_vm0 = vcmask 261120   ;;  %v1269_v44 = vmov 0.0   ;;  %vm494_vm1 = vcmask 523264   ;;  %s1762_s1 = inlined_call_operand.vmem [shape: f32[32,64], index: 1, kind: input, shape index: {}]   ;;  %s1763_s0 = inlined_call_operand.vmem [shape: f32[256,32], index: 0, kind: input, shape index: {}]   ;;  %s1764_s3 = inlined_call_operand.vmem [shape: f32[64,32], index: 3, kind: input, shape index: {}]   ;;  %s1765_s2 = inlined_call_operand.vmem [shape: f32[1,64], index: 2, kind: input, shape index: {}]   ;;  %s1766_s4 = inlined_call_operand.vmem [shape: f32[1,32], index: 4, kind: input, shape index: {}]   ;;  %s1767_s5 = inlined_call_operand.vmem [shape: f32[256,32], index: 5, kind: output, shape index: {}]  }
   0x1   :  { %v92_v0 = vld [vmem:[%s1762_s1 + $0x18] sm:$0xff]  ;;  %v91_v1 = vld [vmem:[%s1762_s1 + $0x10] sm:$0xff]  ;;  %v57_v2 = vld [vmem:[%s1763_s0] sm:$0xff]  ;;  %26 = vst.msk [vmem:[#allocation2 + $0x8] sm:$0xff] %vm24_vm0, %v1269_v44 }
   0x2   :  { %1132 = vmatprep.subr.mxu0 %v92_v0  ;;  %v90_v3 = vld [vmem:[%s1762_s1 + $0x8] sm:$0xff]  ;;  %1140 = vmatprep.mubr.msk.f32.mxu0 %vm24_vm0, %v57_v2  ;;  %v89_v4 = vld [vmem:[%s1762_s1] sm:$0xff]  ;;  %v59_v6 = vld [vmem:[%s1763_s0 + $0x10] sm:$0xff]  ;;  %25 = vst.msk [vmem:[#allocation2] sm:$0xff] %vm24_vm0, %v1269_v44 }
   0x3   :  { %1133 = vmatpush3.msra.mxu0 %v92_v0  ;;  %v58_v5 = vld [vmem:[%s1763_s0 + $0x8] sm:$0xff]  ;;  %v60_v7 = vld [vmem:[%s1763_s0 + $0x18] sm:$0xff]  ;;  %v61_v8 = vld [vmem:[%s1763_s0 + $0x20] sm:$0xff]  ;;  %27 = vst.msk [vmem:[#allocation2 + $0x10] sm:$0xff] %vm24_vm0, %v1269_v44 }
   0x4   :  { %1134 = vmatprep.subr.mxu0 %v91_v1  ;;  %v493_v9 = vld [vmem:[%s1764_s3 + $0x38] sm:$0xff]  ;;  %v492_v10 = vld [vmem:[%s1764_s3 + $0x30] sm:$0xff]  ;;  %v62_v11 = vld [vmem:[%s1763_s0 + $0x28] sm:$0xff]  ;;  %28 = vst.msk [vmem:[#allocation2 + $0x18] sm:$0xff] %vm24_vm0, %v1269_v44 }
   0x5   :  { %1135 = vmatpush3.msra.mxu0 %v91_v1  ;;  %v491_v12 = vld [vmem:[%s1764_s3 + $0x28] sm:$0xff]  ;;  %v63_v13 = vld [vmem:[%s1763_s0 + $0x30] sm:$0xff]  ;;  %1252 = vmatprep.subr.mxu1 %v493_v9  ;;  %v490_v14 = vld [vmem:[%s1764_s3 + $0x20] sm:$0xff]  ;;  %29 = vst.msk [vmem:[#allocation2 + $0x20] sm:$0xff] %vm24_vm0, %v1269_v44 }
   0x6   :  { %1136 = vmatprep.subr.mxu0 %v90_v3  ;;  %1260 = vmatpush3.msra.mxu1 %v493_v9  ;;  %v64_v15 = vld [vmem:[%s1763_s0 + $0x38] sm:$0xff]  ;;  %v65_v16 = vld [vmem:[%s1763_s0 + $0x40] sm:$0xff]  ;;  %v66_v17 = vld [vmem:[%s1763_s0 + $0x48] sm:$0xff]  ;;  %30 = vst.msk [vmem:[#allocation2 + $0x28] sm:$0xff] %vm24_vm0, %v1269_v44 }
   0x7   :  { %1137 = vmatpush3.msra.mxu0 %v90_v3  ;;  %1253 = vmatprep.subr.mxu1 %v492_v10  ;;  %v67_v18 = vld [vmem:[%s1763_s0 + $0x50] sm:$0xff]  ;;  %v68_v19 = vld [vmem:[%s1763_s0 + $0x58] sm:$0xff]  ;;  %v69_v20 = vld [vmem:[%s1763_s0 + $0x60] sm:$0xff]  ;;  %31 = vst.msk [vmem:[#allocation2 + $0x30] sm:$0xff] %vm24_vm0, %v1269_v44 }
   0x8   :  { %1138 = vmatprep.subr.mxu0 %v89_v4  ;;  %1261 = vmatpush3.msra.mxu1 %v492_v10  ;;  %v70_v21 = vld [vmem:[%s1763_s0 + $0x68] sm:$0xff]  ;;  %v71_v22 = vld [vmem:[%s1763_s0 + $0x70] sm:$0xff]  ;;  %v72_v23 = vld [vmem:[%s1763_s0 + $0x78] sm:$0xff]  ;;  %32 = vst.msk [vmem:[#allocation2 + $0x38] sm:$0xff] %vm24_vm0, %v1269_v44 }
   0x9   :  { %1139 = vmatpush3.msra.mxu0 %v89_v4  ;;  %1254 = vmatprep.subr.mxu1 %v491_v12  ;;  %v73_v24 = vld [vmem:[%s1763_s0 + $0x80] sm:$0xff]  ;;  %v74_v25 = vld [vmem:[%s1763_s0 + $0x88] sm:$0xff]  ;;  %v75_v26 = vld [vmem:[%s1763_s0 + $0x90] sm:$0xff]  ;;  %33 = vst.msk [vmem:[#allocation2 + $0x40] sm:$0xff] %vm24_vm0, %v1269_v44 }
   0xa   :  { %1141 = vmatmul.mubr.msk.f32.vlgmr.msra.gmra.mxu0 %vm24_vm0, %v58_v5  ;;  %1188 = vmatprep.subr.mxu0 %v493_v9  ;;  %v76_v27 = vld [vmem:[%s1763_s0 + $0x98] sm:$0xff]  ;;  %v77_v28 = vld [vmem:[%s1763_s0 + $0xa0] sm:$0xff]  ;;  %v78_v29 = vld [vmem:[%s1763_s0 + $0xa8] sm:$0xff]  ;;  %34 = vst.msk [vmem:[#allocation2 + $0x48] sm:$0xff] %vm24_vm0, %v1269_v44 }
   0xb   :  { %1143 = vmatprep.mubr.msk.f32.mxu0 %vm24_vm0, %v59_v6  ;;  %1189 = vmatpush3.msra.mxu0 %v493_v9  ;;  %v79_v30 = vld [vmem:[%s1763_s0 + $0xb0] sm:$0xff]  ;;  %v80_v31 = vld [vmem:[%s1763_s0 + $0xb8] sm:$0xff]  ;;  %v81_v32 = vld [vmem:[%s1763_s0 + $0xc0] sm:$0xff]  ;;  %35 = vst.msk [vmem:[#allocation2 + $0x50] sm:$0xff] %vm24_vm0, %v1269_v44 }
   0xc   :  { %1190 = vmatprep.subr.mxu0 %v492_v10  ;;  %1262 = vmatpush3.msra.mxu1 %v491_v12  ;;  %v82_v33 = vld [vmem:[%s1763_s0 + $0xc8] sm:$0xff]  ;;  %v83_v34 = vld [vmem:[%s1763_s0 + $0xd0] sm:$0xff]  ;;  %v84_v35 = vld [vmem:[%s1763_s0 + $0xd8] sm:$0xff]  ;;  %36 = vst.msk [vmem:[#allocation2 + $0x58] sm:$0xff] %vm24_vm0, %v1269_v44 }
   0xd   :  { %1191 = vmatpush3.msra.mxu0 %v492_v10  ;;  %1255 = vmatprep.subr.mxu1 %v490_v14  ;;  %v85_v36 = vld [vmem:[%s1763_s0 + $0xe0] sm:$0xff]  ;;  %v86_v37 = vld [vmem:[%s1763_s0 + $0xe8] sm:$0xff]  ;;  %v87_v38 = vld [vmem:[%s1763_s0 + $0xf0] sm:$0xff]  ;;  %37 = vst.msk [vmem:[#allocation2 + $0x60] sm:$0xff] %vm24_vm0, %v1269_v44 }
   0xe   :  { %1144 = vmatmul.mubr.msk.f32.gmra.mxu0 %vm24_vm0, %v60_v7  ;;  %1192 = vmatprep.subr.mxu0 %v491_v12  ;;  %v88_v39 = vld [vmem:[%s1763_s0 + $0xf8] sm:$0xff]  ;;  %v488_v41 = vld [vmem:[%s1764_s3 + $0x10] sm:$0xff]  ;;  %v487_v42 = vld [vmem:[%s1764_s3 + $0x8] sm:$0xff]  ;;  %38 = vst.msk [vmem:[#allocation2 + $0x68] sm:$0xff] %vm24_vm0, %v1269_v44 }
   0xf   :  { %1146 = vmatprep.mubr.msk.f32.mxu0 %vm24_vm0, %v61_v8  ;;  %1193 = vmatpush3.msra.mxu0 %v491_v12  ;;  %v489_v40 = vld [vmem:[%s1764_s3 + $0x18] sm:$0xff]  ;;  %v486_v43 = vld [vmem:[%s1764_s3] sm:$0xff]  ;;  %39 = vst.msk [vmem:[#allocation2 + $0x70] sm:$0xff] %vm24_vm0, %v1269_v44  ;;  %40 = vst.msk [vmem:[#allocation2 + $0x78] sm:$0xff] %vm24_vm0, %v1269_v44 }
  0x10   :  { %1194 = vmatprep.subr.mxu0 %v490_v14  ;;  %1263 = vmatpush3.msra.mxu1 %v490_v14  ;;  %41 = vst.msk [vmem:[#allocation2 + $0x80] sm:$0xff] %vm24_vm0, %v1269_v44  ;;  %42 = vst.msk [vmem:[#allocation2 + $0x88] sm:$0xff] %vm24_vm0, %v1269_v44  ;;  %v1499_v45 = vld [vmem:[%s1765_s2] ss:$0 sm:$0xff] }
  0x11   :  { %1195 = vmatpush3.msra.mxu0 %v490_v14  ;;  %1256 = vmatprep.subr.mxu1 %v489_v40  ;;  %43 = vst.msk [vmem:[#allocation2 + $0x90] sm:$0xff] %vm24_vm0, %v1269_v44  ;;  %44 = vst.msk [vmem:[#allocation2 + $0x98] sm:$0xff] %vm24_vm0, %v1269_v44 }
  0x12   :  { %1147 = vmatmul.mubr.msk.f32.gmra.mxu0 %vm24_vm0, %v62_v11  ;;  %1196 = vmatprep.subr.mxu0 %v489_v40  ;;  %45 = vst.msk [vmem:[#allocation2 + $0xa0] sm:$0xff] %vm24_vm0, %v1269_v44  ;;  %46 = vst.msk [vmem:[#allocation2 + $0xa8] sm:$0xff] %vm24_vm0, %v1269_v44 }
  0x13   :  { %1149 = vmatprep.mubr.msk.f32.mxu0 %vm24_vm0, %v63_v13  ;;  %1197 = vmatpush3.msra.mxu0 %v489_v40  ;;  %47 = vst.msk [vmem:[#allocation2 + $0xb0] sm:$0xff] %vm24_vm0, %v1269_v44  ;;  %48 = vst.msk [vmem:[#allocation2 + $0xb8] sm:$0xff] %vm24_vm0, %v1269_v44 }
  0x14   :  { %1264 = vmatpush3.msra.mxu1 %v489_v40  ;;  %1198 = vmatprep.subr.mxu0 %v488_v41  ;;  %49 = vst.msk [vmem:[#allocation2 + $0xc0] sm:$0xff] %vm24_vm0, %v1269_v44  ;;  %50 = vst.msk [vmem:[#allocation2 + $0xc8] sm:$0xff] %vm24_vm0, %v1269_v44 }
  0x15   :  { %1257 = vmatprep.subr.mxu1 %v488_v41  ;;  %1199 = vmatpush3.msra.mxu0 %v488_v41  ;;  %51 = vst.msk [vmem:[#allocation2 + $0xd0] sm:$0xff] %vm24_vm0, %v1269_v44  ;;  %52 = vst.msk [vmem:[#allocation2 + $0xd8] sm:$0xff] %vm24_vm0, %v1269_v44 }
  0x16   :  { %1150 = vmatmul.mubr.msk.f32.gmra.mxu0 %vm24_vm0, %v64_v15  ;;  %1265 = vmatpush3.msra.mxu1 %v488_v41  ;;  %53 = vst.msk [vmem:[#allocation2 + $0xe0] sm:$0xff] %vm24_vm0, %v1269_v44  ;;  %54 = vst.msk [vmem:[#allocation2 + $0xe8] sm:$0xff] %vm24_vm0, %v1269_v44 }
  0x17   :  { %1152 = vmatprep.mubr.msk.f32.mxu0 %vm24_vm0, %v65_v16  ;;  %1200 = vmatprep.subr.mxu0 %v487_v42  ;;  %55 = vst.msk [vmem:[#allocation2 + $0xf0] sm:$0xff] %vm24_vm0, %v1269_v44  ;;  %56 = vst.msk [vmem:[#allocation2 + $0xf8] sm:$0xff] %vm24_vm0, %v1269_v44 }
  0x18   :  { %1258 = vmatprep.subr.mxu1 %v487_v42  ;;  %1201 = vmatpush3.msra.mxu0 %v487_v42 }
  0x19   :  { %1266 = vmatpush3.msra.mxu1 %v487_v42  ;;  %1202 = vmatprep.subr.mxu0 %v486_v43 }
  0x1a   :  { %1153 = vmatmul.mubr.msk.f32.gmra.mxu0 %vm24_vm0, %v66_v17  ;;  %1259 = vmatprep.subr.mxu1 %v486_v43 }
  0x1b   :  { %1155 = vmatprep.mubr.msk.f32.mxu0 %vm24_vm0, %v67_v18  ;;  %1203 = vmatpush3.msra.mxu0 %v486_v43 }
  0x1c   :  { %1267 = vmatpush3.msra.mxu1 %v486_v43 }
  0x1e   :  { %1156 = vmatmul.mubr.msk.f32.gmra.mxu0 %vm24_vm0, %v68_v19 }
  0x1f   :  { %1158 = vmatprep.mubr.msk.f32.mxu0 %vm24_vm0, %v69_v20 }
  0x22   :  { %1159 = vmatmul.mubr.msk.f32.gmra.mxu0 %vm24_vm0, %v70_v21 }
  0x23   :  { %1161 = vmatprep.mubr.msk.f32.mxu0 %vm24_vm0, %v71_v22 }
  0x26   :  { %1162 = vmatmul.mubr.msk.f32.gmra.mxu0 %vm24_vm0, %v72_v23 }
  0x27   :  { %1164 = vmatprep.mubr.msk.f32.mxu0 %vm24_vm0, %v73_v24 }
  0x2a   :  { %1165 = vmatmul.mubr.msk.f32.gmra.mxu0 %vm24_vm0, %v74_v25 }
  0x2b   :  { %1167 = vmatprep.mubr.msk.f32.mxu0 %vm24_vm0, %v75_v26 }
  0x2e   :  { %1168 = vmatmul.mubr.msk.f32.gmra.mxu0 %vm24_vm0, %v76_v27 }
  0x2f   :  { %1170 = vmatprep.mubr.msk.f32.mxu0 %vm24_vm0, %v77_v28 }
  0x32   :  { %1171 = vmatmul.mubr.msk.f32.gmra.mxu0 %vm24_vm0, %v78_v29 }
  0x33   :  { %1173 = vmatprep.mubr.msk.f32.mxu0 %vm24_vm0, %v79_v30 }
  0x36   :  { %1174 = vmatmul.mubr.msk.f32.gmra.mxu0 %vm24_vm0, %v80_v31 }
  0x37   :  { %1176 = vmatprep.mubr.msk.f32.mxu0 %vm24_vm0, %v81_v32 }
  0x3a   :  { %1177 = vmatmul.mubr.msk.f32.gmra.mxu0 %vm24_vm0, %v82_v33 }
  0x3b   :  { %1179 = vmatprep.mubr.msk.f32.mxu0 %vm24_vm0, %v83_v34 }
  0x3e   :  { %1180 = vmatmul.mubr.msk.f32.gmra.mxu0 %vm24_vm0, %v84_v35 }
  0x3f   :  { %1182 = vmatprep.mubr.msk.f32.mxu0 %vm24_vm0, %v85_v36 }
  0x42   :  { %1183 = vmatmul.mubr.msk.f32.gmra.mxu0 %vm24_vm0, %v86_v37 }
  0x43   :  { %1185 = vmatprep.mubr.msk.f32.mxu0 %vm24_vm0, %v87_v38 }
  0x46   :  { %1186 = vmatmul.mubr.msk.f32.gmra.mxu0 %vm24_vm0, %v88_v39 }
  0xca   :  { %v1142_v46 = vpop.f32.mrf.mxu0 }
  0xcb   :  { %v269_v47 = vadd.f32 %v1142_v46, %v1499_v45 }
  0xcc   :  { %v263_v48 = vpop.f32.mrf.mxu0 }
  0xcd   :  { %v264_v49 = vadd.f32 %v1499_v45, %v263_v48  ;;  %v423_v52 = vmax.f32 %v269_v47, 0.0 }
  0xce   :  { %v1145_v50 = vpop.f32.mrf.mxu0 }
  0xcf   :  { %v422_v51 = vmax.f32 %v264_v49, 0.0  ;;  %v279_v53 = vadd.f32 %v1145_v50, %v1499_v45 }
  0xd0   :  { %v273_v54 = vpop.f32.mrf.mxu0 }
  0xd1   :  { %v274_v55 = vadd.f32 %v1499_v45, %v273_v54  ;;  %1204 = vmatprep.mubr.msk.f32.mxu0 %vm494_vm1, %v422_v51  ;;  %v425_v58 = vmax.f32 %v279_v53, 0.0 }
  0xd2   :  { %v1148_v56 = vpop.f32.mrf.mxu0  ;;  %1205 = vmatmul.mubr.msk.f32.vlgmr.msra.gmra.mxu0 %vm494_vm1, %v423_v52 }
  0xd3   :  { %v424_v57 = vmax.f32 %v274_v55, 0.0  ;;  %v289_v59 = vadd.f32 %v1148_v56, %v1499_v45 }
  0xd4   :  { %v283_v60 = vpop.f32.mrf.mxu0 }
  0xd5   :  { %v284_v61 = vadd.f32 %v1499_v45, %v283_v60  ;;  %1207 = vmatprep.mubr.msk.f32.mxu1 %vm494_vm1, %v424_v57  ;;  %v427_v0 = vmax.f32 %v289_v59, 0.0 }
  0xd6   :  { %v1151_v62 = vpop.f32.mrf.mxu0  ;;  %1208 = vmatmul.mubr.msk.f32.vlgmr.msra.gmra.mxu1 %vm494_vm1, %v425_v58 }
  0xd7   :  { %v426_v63 = vmax.f32 %v284_v61, 0.0  ;;  %v299_v1 = vadd.f32 %v1151_v62, %v1499_v45 }
  0xd8   :  { %v293_v2 = vpop.f32.mrf.mxu0 }
  0xd9   :  { %v294_v3 = vadd.f32 %v1499_v45, %v293_v2  ;;  %1210 = vmatprep.mubr.msk.f32.mxu1 %vm494_vm1, %v426_v63  ;;  %v429_v6 = vmax.f32 %v299_v1, 0.0 }
  0xda   :  { %v1154_v4 = vpop.f32.mrf.mxu0  ;;  %1211 = vmatmul.mubr.msk.f32.gmra.mxu1 %vm494_vm1, %v427_v0 }
  0xdb   :  { %v428_v5 = vmax.f32 %v294_v3, 0.0  ;;  %v309_v7 = vadd.f32 %v1154_v4, %v1499_v45 }
  0xdc   :  { %v303_v8 = vpop.f32.mrf.mxu0 }
  0xdd   :  { %v304_v9 = vadd.f32 %v1499_v45, %v303_v8  ;;  %1213 = vmatprep.mubr.msk.f32.mxu1 %vm494_vm1, %v428_v5  ;;  %v431_v12 = vmax.f32 %v309_v7, 0.0 }
  0xde   :  { %v1157_v10 = vpop.f32.mrf.mxu0  ;;  %1214 = vmatmul.mubr.msk.f32.gmra.mxu1 %vm494_vm1, %v429_v6 }
  0xdf   :  { %v430_v11 = vmax.f32 %v304_v9, 0.0  ;;  %v319_v13 = vadd.f32 %v1157_v10, %v1499_v45 }
  0xe0   :  { %v313_v14 = vpop.f32.mrf.mxu0 }
  0xe1   :  { %v314_v15 = vadd.f32 %v1499_v45, %v313_v14  ;;  %1216 = vmatprep.mubr.msk.f32.mxu1 %vm494_vm1, %v430_v11  ;;  %v433_v18 = vmax.f32 %v319_v13, 0.0 }
  0xe2   :  { %v1160_v16 = vpop.f32.mrf.mxu0  ;;  %1217 = vmatmul.mubr.msk.f32.gmra.mxu1 %vm494_vm1, %v431_v12 }
  0xe3   :  { %v432_v17 = vmax.f32 %v314_v15, 0.0  ;;  %v329_v19 = vadd.f32 %v1160_v16, %v1499_v45  ;;  %v455_v15 = vld [vmem:[#allocation2 + $0x8] sm:$0xff] }
  0xe4   :  { %v323_v20 = vpop.f32.mrf.mxu0 }
  0xe5   :  { %v324_v21 = vadd.f32 %v1499_v45, %v323_v20  ;;  %1219 = vmatprep.mubr.msk.f32.mxu1 %vm494_vm1, %v432_v17  ;;  %v435_v24 = vmax.f32 %v329_v19, 0.0  ;;  %v454_v17 = vld [vmem:[#allocation2] sm:$0xff]  ;;  %v457_v20 = vld [vmem:[#allocation2 + $0x18] sm:$0xff] }
  0xe6   :  { %v1163_v22 = vpop.f32.mrf.mxu0  ;;  %1220 = vmatmul.mubr.msk.f32.gmra.mxu1 %vm494_vm1, %v433_v18 }
  0xe7   :  { %v434_v23 = vmax.f32 %v324_v21, 0.0  ;;  %v339_v25 = vadd.f32 %v1163_v22, %v1499_v45  ;;  %v456_v22 = vld [vmem:[#allocation2 + $0x10] sm:$0xff] }
  0xe8   :  { %v333_v26 = vpop.f32.mrf.mxu0 }
  0xe9   :  { %v334_v27 = vadd.f32 %v1499_v45, %v333_v26  ;;  %1222 = vmatprep.mubr.msk.f32.mxu1 %vm494_vm1, %v434_v23  ;;  %v437_v30 = vmax.f32 %v339_v25, 0.0  ;;  %v459_v25 = vld [vmem:[#allocation2 + $0x28] sm:$0xff] }
  0xea   :  { %v1166_v28 = vpop.f32.mrf.mxu0  ;;  %1223 = vmatmul.mubr.msk.f32.gmra.mxu1 %vm494_vm1, %v435_v24 }
  0xeb   :  { %v436_v29 = vmax.f32 %v334_v27, 0.0  ;;  %v349_v31 = vadd.f32 %v1166_v28, %v1499_v45  ;;  %v1571_v27 = vld [vmem:[%s1766_s4] ss:$0 sm:$0xff] }
  0xec   :  { %v343_v32 = vpop.f32.mrf.mxu0 }
  0xed   :  { %v344_v33 = vadd.f32 %v1499_v45, %v343_v32  ;;  %1225 = vmatprep.mubr.msk.f32.mxu1 %vm494_vm1, %v436_v29  ;;  %v439_v36 = vmax.f32 %v349_v31, 0.0  ;;  %v458_v29 = vld [vmem:[#allocation2 + $0x20] sm:$0xff] }
  0xee   :  { %v1169_v34 = vpop.f32.mrf.mxu0  ;;  %1226 = vmatmul.mubr.msk.f32.gmra.mxu1 %vm494_vm1, %v437_v30 }
  0xef   :  { %v438_v35 = vmax.f32 %v344_v33, 0.0  ;;  %v359_v37 = vadd.f32 %v1169_v34, %v1499_v45  ;;  %v461_v33 = vld [vmem:[#allocation2 + $0x38] sm:$0xff] }
  0xf0   :  { %v353_v38 = vpop.f32.mrf.mxu0 }
  0xf1   :  { %v354_v39 = vadd.f32 %v1499_v45, %v353_v38  ;;  %1228 = vmatprep.mubr.msk.f32.mxu1 %vm494_vm1, %v438_v35  ;;  %v441_v42 = vmax.f32 %v359_v37, 0.0  ;;  %v460_v38 = vld [vmem:[#allocation2 + $0x30] sm:$0xff] }
  0xf2   :  { %v1172_v40 = vpop.f32.mrf.mxu0  ;;  %1229 = vmatmul.mubr.msk.f32.gmra.mxu1 %vm494_vm1, %v439_v36 }
  0xf3   :  { %v440_v41 = vmax.f32 %v354_v39, 0.0  ;;  %v369_v43 = vadd.f32 %v1172_v40, %v1499_v45 }
  0xf4   :  { %v363_v44 = vpop.f32.mrf.mxu0 }
  0xf5   :  { %v364_v46 = vadd.f32 %v1499_v45, %v363_v44  ;;  %1231 = vmatprep.mubr.msk.f32.mxu1 %vm494_vm1, %v440_v41  ;;  %v443_v49 = vmax.f32 %v369_v43, 0.0  ;;  %v463_v43 = vld [vmem:[#allocation2 + $0x48] sm:$0xff] }
  0xf6   :  { %v1175_v47 = vpop.f32.mrf.mxu0  ;;  %1232 = vmatmul.mubr.msk.f32.gmra.mxu1 %vm494_vm1, %v441_v42 }
  0xf7   :  { %v442_v48 = vmax.f32 %v364_v46, 0.0  ;;  %v379_v50 = vadd.f32 %v1175_v47, %v1499_v45 }
  0xf8   :  { %v373_v51 = vpop.f32.mrf.mxu0 }
  0xf9   :  { %v374_v52 = vadd.f32 %v1499_v45, %v373_v51  ;;  %1234 = vmatprep.mubr.msk.f32.mxu1 %vm494_vm1, %v442_v48  ;;  %v445_v55 = vmax.f32 %v379_v50, 0.0 }
  0xfa   :  { %v1178_v53 = vpop.f32.mrf.mxu0  ;;  %1235 = vmatmul.mubr.msk.f32.gmra.mxu1 %vm494_vm1, %v443_v49  ;;  %v462_v49 = vld [vmem:[#allocation2 + $0x40] sm:$0xff] }
  0xfb   :  { %v444_v54 = vmax.f32 %v374_v52, 0.0  ;;  %v389_v56 = vadd.f32 %v1178_v53, %v1499_v45 }
  0xfc   :  { %v383_v57 = vpop.f32.mrf.mxu0 }
  0xfd   :  { %v384_v58 = vadd.f32 %v1499_v45, %v383_v57  ;;  %1237 = vmatprep.mubr.msk.f32.mxu1 %vm494_vm1, %v444_v54  ;;  %v447_v61 = vmax.f32 %v389_v56, 0.0  ;;  %v465_v54 = vld [vmem:[#allocation2 + $0x58] sm:$0xff] }
  0xfe   :  { %v1181_v59 = vpop.f32.mrf.mxu0  ;;  %1238 = vmatmul.mubr.msk.f32.gmra.mxu1 %vm494_vm1, %v445_v55 }
  0xff   :  { %v446_v60 = vmax.f32 %v384_v58, 0.0  ;;  %v399_v62 = vadd.f32 %v1181_v59, %v1499_v45  ;;  %v464_v59 = vld [vmem:[#allocation2 + $0x50] sm:$0xff] }
 0x100   :  { %v393_v63 = vpop.f32.mrf.mxu0 }
 0x101   :  { %v394_v0 = vadd.f32 %v1499_v45, %v393_v63  ;;  %1240 = vmatprep.mubr.msk.f32.mxu1 %vm494_vm1, %v446_v60  ;;  %v449_v3 = vmax.f32 %v399_v62, 0.0 }
 0x102   :  { %v1184_v1 = vpop.f32.mrf.mxu0  ;;  %1241 = vmatmul.mubr.msk.f32.gmra.mxu1 %vm494_vm1, %v447_v61 }
 0x103   :  { %v448_v2 = vmax.f32 %v394_v0, 0.0  ;;  %v409_v4 = vadd.f32 %v1184_v1, %v1499_v45  ;;  %v467_v0 = vld [vmem:[#allocation2 + $0x68] sm:$0xff] }
 0x104   :  { %v403_v5 = vpop.f32.mrf.mxu0 }
 0x105   :  { %v404_v6 = vadd.f32 %v1499_v45, %v403_v5  ;;  %1243 = vmatprep.mubr.msk.f32.mxu1 %vm494_vm1, %v448_v2  ;;  %v451_v9 = vmax.f32 %v409_v4, 0.0  ;;  %v466_v5 = vld [vmem:[#allocation2 + $0x60] sm:$0xff] }
 0x106   :  { %v1187_v7 = vpop.f32.mrf.mxu0  ;;  %1244 = vmatmul.mubr.msk.f32.gmra.mxu1 %vm494_vm1, %v449_v3 }
 0x107   :  { %v450_v8 = vmax.f32 %v404_v6, 0.0  ;;  %v419_v10 = vadd.f32 %v1187_v7, %v1499_v45 }
 0x108   :  { %v413_v11 = vpop.f32.mrf.mxu0 }
 0x109   :  { %v414_v12 = vadd.f32 %v1499_v45, %v413_v11  ;;  %1246 = vmatprep.mubr.msk.f32.mxu1 %vm494_vm1, %v450_v8  ;;  %v453_v14 = vmax.f32 %v419_v10, 0.0  ;;  %v469_v10 = vld [vmem:[#allocation2 + $0x78] sm:$0xff] }
 0x10a   :  { %1247 = vmatmul.mubr.msk.f32.gmra.mxu1 %vm494_vm1, %v451_v9 }
 0x10b   :  { %v452_v13 = vmax.f32 %v414_v12, 0.0 }
 0x10d   :  { %1249 = vmatprep.mubr.msk.f32.mxu1 %vm494_vm1, %v452_v13 }
 0x10e   :  { %1250 = vmatmul.mubr.msk.f32.gmra.mxu1 %vm494_vm1, %v453_v14 }
 0x192   :  { %v1206_v16 = vpop.f32.mrf.mxu0 }
 0x193   :  { %v817_v18 = vadd.f32 %v1206_v16, %v455_v15  ;;  %v468_v15 = vld [vmem:[#allocation2 + $0x70] sm:$0xff] }
 0x194   :  { %v657_v19 = vpop.f32.mrf.mxu0 }
 0x195   :  { %849 = vst.msk [vmem:[#allocation2 + $0x8] sm:$0xff] %vm24_vm0, %v817_v18  ;;  %v816_v21 = vadd.f32 %v657_v19, %v454_v17 }
 0x196   :  { %v1209_v45 = vpop.f32.mrf.mxu1 }
 0x197   :  { %848 = vst.msk [vmem:[#allocation2] sm:$0xff] %vm24_vm0, %v816_v21  ;;  %v819_v23 = vadd.f32 %v1209_v45, %v457_v20  ;;  %v471_v20 = vld [vmem:[#allocation2 + $0x88] sm:$0xff] }
 0x198   :  { %v667_v24 = vpop.f32.mrf.mxu1 }
 0x199   :  { %851 = vst.msk [vmem:[#allocation2 + $0x18] sm:$0xff] %vm24_vm0, %v819_v23  ;;  %v818_v26 = vadd.f32 %v667_v24, %v456_v22  ;;  %v470_v24 = vld [vmem:[#allocation2 + $0x80] sm:$0xff] }
 0x19a   :  { %v1212_v28 = vpop.f32.mrf.mxu1 }
 0x19b   :  { %850 = vst.msk [vmem:[#allocation2 + $0x10] sm:$0xff] %vm24_vm0, %v818_v26  ;;  %v821_v30 = vadd.f32 %v1212_v28, %v459_v25 }
 0x19c   :  { %v884_v31 = vld [vmem:[#allocation2 + $0x8] sm:$0xff]  ;;  %v677_v32 = vpop.f32.mrf.mxu1 }
 0x19d   :  { %v923_v34 = vadd.f32 %v1571_v27, %v884_v31  ;;  %853 = vst.msk [vmem:[#allocation2 + $0x28] sm:$0xff] %vm24_vm0, %v821_v30  ;;  %v820_v35 = vadd.f32 %v677_v32, %v458_v29  ;;  %v473_v30 = vld [vmem:[#allocation2 + $0x98] sm:$0xff] }
 0x19e   :  { %v883_v36 = vld [vmem:[#allocation2] sm:$0xff]  ;;  %v1215_v37 = vpop.f32.mrf.mxu1 }
 0x19f   :  { %955 = vst.msk [vmem:[%s1767_s5 + $0x8] sm:$0xff] %vm24_vm0, %v923_v34  ;;  %v922_v39 = vadd.f32 %v1571_v27, %v883_v36  ;;  %852 = vst.msk [vmem:[#allocation2 + $0x20] sm:$0xff] %vm24_vm0, %v820_v35  ;;  %v823_v40 = vadd.f32 %v1215_v37, %v461_v33  ;;  %v472_v35 = vld [vmem:[#allocation2 + $0x90] sm:$0xff] }
 0x1a0   :  { %v886_v41 = vld [vmem:[#allocation2 + $0x18] sm:$0xff]  ;;  %v687_v42 = vpop.f32.mrf.mxu1 }
 0x1a1   :  { %954 = vst.msk [vmem:[%s1767_s5] sm:$0xff] %vm24_vm0, %v922_v39  ;;  %v925_v44 = vadd.f32 %v1571_v27, %v886_v41  ;;  %855 = vst.msk [vmem:[#allocation2 + $0x38] sm:$0xff] %vm24_vm0, %v823_v40  ;;  %v822_v46 = vadd.f32 %v687_v42, %v460_v38  ;;  %v475_v40 = vld [vmem:[#allocation2 + $0xa8] sm:$0xff] }
 0x1a2   :  { %v885_v47 = vld [vmem:[#allocation2 + $0x10] sm:$0xff]  ;;  %v1218_v48 = vpop.f32.mrf.mxu1 }
 0x1a3   :  { %957 = vst.msk [vmem:[%s1767_s5 + $0x18] sm:$0xff] %vm24_vm0, %v925_v44  ;;  %v924_v50 = vadd.f32 %v1571_v27, %v885_v47  ;;  %854 = vst.msk [vmem:[#allocation2 + $0x30] sm:$0xff] %vm24_vm0, %v822_v46  ;;  %v825_v51 = vadd.f32 %v1218_v48, %v463_v43  ;;  %v474_v46 = vld [vmem:[#allocation2 + $0xa0] sm:$0xff] }
 0x1a4   :  { %v888_v52 = vld [vmem:[#allocation2 + $0x28] sm:$0xff]  ;;  %v697_v53 = vpop.f32.mrf.mxu1 }
 0x1a5   :  { %956 = vst.msk [vmem:[%s1767_s5 + $0x10] sm:$0xff] %vm24_vm0, %v924_v50  ;;  %v927_v55 = vadd.f32 %v1571_v27, %v888_v52  ;;  %857 = vst.msk [vmem:[#allocation2 + $0x48] sm:$0xff] %vm24_vm0, %v825_v51  ;;  %v824_v56 = vadd.f32 %v697_v53, %v462_v49  ;;  %v477_v51 = vld [vmem:[#allocation2 + $0xb8] sm:$0xff] }
 0x1a6   :  { %v887_v57 = vld [vmem:[#allocation2 + $0x20] sm:$0xff]  ;;  %v1221_v58 = vpop.f32.mrf.mxu1 }
 0x1a7   :  { %959 = vst.msk [vmem:[%s1767_s5 + $0x28] sm:$0xff] %vm24_vm0, %v927_v55  ;;  %v926_v60 = vadd.f32 %v1571_v27, %v887_v57  ;;  %856 = vst.msk [vmem:[#allocation2 + $0x40] sm:$0xff] %vm24_vm0, %v824_v56  ;;  %v827_v61 = vadd.f32 %v1221_v58, %v465_v54  ;;  %v476_v56 = vld [vmem:[#allocation2 + $0xb0] sm:$0xff] }
 0x1a8   :  { %v890_v62 = vld [vmem:[#allocation2 + $0x38] sm:$0xff]  ;;  %v707_v63 = vpop.f32.mrf.mxu1 }
 0x1a9   :  { %958 = vst.msk [vmem:[%s1767_s5 + $0x20] sm:$0xff] %vm24_vm0, %v926_v60  ;;  %v929_v1 = vadd.f32 %v1571_v27, %v890_v62  ;;  %859 = vst.msk [vmem:[#allocation2 + $0x58] sm:$0xff] %vm24_vm0, %v827_v61  ;;  %v826_v2 = vadd.f32 %v707_v63, %v464_v59  ;;  %v479_v61 = vld [vmem:[#allocation2 + $0xc8] sm:$0xff] }
 0x1aa   :  { %v889_v3 = vld [vmem:[#allocation2 + $0x30] sm:$0xff]  ;;  %v1224_v4 = vpop.f32.mrf.mxu1 }
 0x1ab   :  { %961 = vst.msk [vmem:[%s1767_s5 + $0x38] sm:$0xff] %vm24_vm0, %v929_v1  ;;  %v928_v6 = vadd.f32 %v1571_v27, %v889_v3  ;;  %858 = vst.msk [vmem:[#allocation2 + $0x50] sm:$0xff] %vm24_vm0, %v826_v2  ;;  %v829_v7 = vadd.f32 %v1224_v4, %v467_v0  ;;  %v478_v2 = vld [vmem:[#allocation2 + $0xc0] sm:$0xff] }
 0x1ac   :  { %v892_v8 = vld [vmem:[#allocation2 + $0x48] sm:$0xff]  ;;  %v717_v9 = vpop.f32.mrf.mxu1 }
 0x1ad   :  { %960 = vst.msk [vmem:[%s1767_s5 + $0x30] sm:$0xff] %vm24_vm0, %v928_v6  ;;  %v931_v11 = vadd.f32 %v1571_v27, %v892_v8  ;;  %861 = vst.msk [vmem:[#allocation2 + $0x68] sm:$0xff] %vm24_vm0, %v829_v7  ;;  %v828_v12 = vadd.f32 %v717_v9, %v466_v5  ;;  %v481_v7 = vld [vmem:[#allocation2 + $0xd8] sm:$0xff] }
 0x1ae   :  { %v891_v13 = vld [vmem:[#allocation2 + $0x40] sm:$0xff]  ;;  %v1227_v14 = vpop.f32.mrf.mxu1 }
 0x1af   :  { %963 = vst.msk [vmem:[%s1767_s5 + $0x48] sm:$0xff] %vm24_vm0, %v931_v11  ;;  %v930_v16 = vadd.f32 %v1571_v27, %v891_v13  ;;  %860 = vst.msk [vmem:[#allocation2 + $0x60] sm:$0xff] %vm24_vm0, %v828_v12  ;;  %v831_v17 = vadd.f32 %v1227_v14, %v469_v10  ;;  %v480_v12 = vld [vmem:[#allocation2 + $0xd0] sm:$0xff] }
 0x1b0   :  { %v894_v18 = vld [vmem:[#allocation2 + $0x58] sm:$0xff]  ;;  %v727_v19 = vpop.f32.mrf.mxu1 }
 0x1b1   :  { %962 = vst.msk [vmem:[%s1767_s5 + $0x40] sm:$0xff] %vm24_vm0, %v930_v16  ;;  %v933_v21 = vadd.f32 %v1571_v27, %v894_v18  ;;  %863 = vst.msk [vmem:[#allocation2 + $0x78] sm:$0xff] %vm24_vm0, %v831_v17  ;;  %v830_v45 = vadd.f32 %v727_v19, %v468_v15  ;;  %v483_v17 = vld [vmem:[#allocation2 + $0xe8] sm:$0xff] }
 0x1b2   :  { %v893_v22 = vld [vmem:[#allocation2 + $0x50] sm:$0xff]  ;;  %v1230_v23 = vpop.f32.mrf.mxu1 }
 0x1b3   :  { %965 = vst.msk [vmem:[%s1767_s5 + $0x58] sm:$0xff] %vm24_vm0, %v933_v21  ;;  %v932_v25 = vadd.f32 %v1571_v27, %v893_v22  ;;  %862 = vst.msk [vmem:[#allocation2 + $0x70] sm:$0xff] %vm24_vm0, %v830_v45  ;;  %v833_v26 = vadd.f32 %v1230_v23, %v471_v20  ;;  %v482_v45 = vld [vmem:[#allocation2 + $0xe0] sm:$0xff] }
 0x1b4   :  { %v896_v28 = vld [vmem:[#allocation2 + $0x68] sm:$0xff]  ;;  %v737_v29 = vpop.f32.mrf.mxu1 }
 0x1b5   :  { %964 = vst.msk [vmem:[%s1767_s5 + $0x50] sm:$0xff] %vm24_vm0, %v932_v25  ;;  %v935_v31 = vadd.f32 %v1571_v27, %v896_v28  ;;  %865 = vst.msk [vmem:[#allocation2 + $0x88] sm:$0xff] %vm24_vm0, %v833_v26  ;;  %v832_v32 = vadd.f32 %v737_v29, %v470_v24  ;;  %v485_v26 = vld [vmem:[#allocation2 + $0xf8] sm:$0xff] }
 0x1b6   :  { %v895_v33 = vld [vmem:[#allocation2 + $0x60] sm:$0xff]  ;;  %v1233_v34 = vpop.f32.mrf.mxu1 }
 0x1b7   :  { %967 = vst.msk [vmem:[%s1767_s5 + $0x68] sm:$0xff] %vm24_vm0, %v935_v31  ;;  %v934_v36 = vadd.f32 %v1571_v27, %v895_v33  ;;  %864 = vst.msk [vmem:[#allocation2 + $0x80] sm:$0xff] %vm24_vm0, %v832_v32  ;;  %v835_v37 = vadd.f32 %v1233_v34, %v473_v30  ;;  %v484_v32 = vld [vmem:[#allocation2 + $0xf0] sm:$0xff] }
 0x1b8   :  { %v898_v38 = vld [vmem:[#allocation2 + $0x78] sm:$0xff]  ;;  %v747_v39 = vpop.f32.mrf.mxu1 }
 0x1b9   :  { %966 = vst.msk [vmem:[%s1767_s5 + $0x60] sm:$0xff] %vm24_vm0, %v934_v36  ;;  %v937_v41 = vadd.f32 %v1571_v27, %v898_v38  ;;  %867 = vst.msk [vmem:[#allocation2 + $0x98] sm:$0xff] %vm24_vm0, %v835_v37  ;;  %v834_v42 = vadd.f32 %v747_v39, %v472_v35 }
 0x1ba   :  { %v897_v43 = vld [vmem:[#allocation2 + $0x70] sm:$0xff]  ;;  %v1236_v44 = vpop.f32.mrf.mxu1 }
 0x1bb   :  { %969 = vst.msk [vmem:[%s1767_s5 + $0x78] sm:$0xff] %vm24_vm0, %v937_v41  ;;  %v936_v47 = vadd.f32 %v1571_v27, %v897_v43  ;;  %866 = vst.msk [vmem:[#allocation2 + $0x90] sm:$0xff] %vm24_vm0, %v834_v42  ;;  %v837_v48 = vadd.f32 %v1236_v44, %v475_v40 }
 0x1bc   :  { %v900_v49 = vld [vmem:[#allocation2 + $0x88] sm:$0xff]  ;;  %v757_v50 = vpop.f32.mrf.mxu1 }
 0x1bd   :  { %968 = vst.msk [vmem:[%s1767_s5 + $0x70] sm:$0xff] %vm24_vm0, %v936_v47  ;;  %v939_v52 = vadd.f32 %v1571_v27, %v900_v49  ;;  %869 = vst.msk [vmem:[#allocation2 + $0xa8] sm:$0xff] %vm24_vm0, %v837_v48  ;;  %v836_v53 = vadd.f32 %v757_v50, %v474_v46 }
 0x1be   :  { %v899_v54 = vld [vmem:[#allocation2 + $0x80] sm:$0xff]  ;;  %v1239_v55 = vpop.f32.mrf.mxu1 }
 0x1bf   :  { %971 = vst.msk [vmem:[%s1767_s5 + $0x88] sm:$0xff] %vm24_vm0, %v939_v52  ;;  %v938_v57 = vadd.f32 %v1571_v27, %v899_v54  ;;  %868 = vst.msk [vmem:[#allocation2 + $0xa0] sm:$0xff] %vm24_vm0, %v836_v53  ;;  %v839_v58 = vadd.f32 %v1239_v55, %v477_v51 }
 0x1c0   :  { %v902_v59 = vld [vmem:[#allocation2 + $0x98] sm:$0xff]  ;;  %v767_v60 = vpop.f32.mrf.mxu1 }
 0x1c1   :  { %970 = vst.msk [vmem:[%s1767_s5 + $0x80] sm:$0xff] %vm24_vm0, %v938_v57  ;;  %v941_v62 = vadd.f32 %v1571_v27, %v902_v59  ;;  %871 = vst.msk [vmem:[#allocation2 + $0xb8] sm:$0xff] %vm24_vm0, %v839_v58  ;;  %v838_v63 = vadd.f32 %v767_v60, %v476_v56 }
 0x1c2   :  { %v901_v0 = vld [vmem:[#allocation2 + $0x90] sm:$0xff]  ;;  %v1242_v1 = vpop.f32.mrf.mxu1 }
 0x1c3   :  { %973 = vst.msk [vmem:[%s1767_s5 + $0x98] sm:$0xff] %vm24_vm0, %v941_v62  ;;  %v940_v3 = vadd.f32 %v1571_v27, %v901_v0  ;;  %870 = vst.msk [vmem:[#allocation2 + $0xb0] sm:$0xff] %vm24_vm0, %v838_v63  ;;  %v841_v4 = vadd.f32 %v1242_v1, %v479_v61 }
 0x1c4   :  { %v904_v5 = vld [vmem:[#allocation2 + $0xa8] sm:$0xff]  ;;  %v777_v6 = vpop.f32.mrf.mxu1 }
 0x1c5   :  { %972 = vst.msk [vmem:[%s1767_s5 + $0x90] sm:$0xff] %vm24_vm0, %v940_v3  ;;  %v943_v8 = vadd.f32 %v1571_v27, %v904_v5  ;;  %873 = vst.msk [vmem:[#allocation2 + $0xc8] sm:$0xff] %vm24_vm0, %v841_v4  ;;  %v840_v9 = vadd.f32 %v777_v6, %v478_v2 }
 0x1c6   :  { %v903_v10 = vld [vmem:[#allocation2 + $0xa0] sm:$0xff]  ;;  %v1245_v11 = vpop.f32.mrf.mxu1 }
 0x1c7   :  { %975 = vst.msk [vmem:[%s1767_s5 + $0xa8] sm:$0xff] %vm24_vm0, %v943_v8  ;;  %v942_v13 = vadd.f32 %v1571_v27, %v903_v10  ;;  %872 = vst.msk [vmem:[#allocation2 + $0xc0] sm:$0xff] %vm24_vm0, %v840_v9  ;;  %v843_v14 = vadd.f32 %v1245_v11, %v481_v7 }
 0x1c8   :  { %v906_v15 = vld [vmem:[#allocation2 + $0xb8] sm:$0xff]  ;;  %v787_v16 = vpop.f32.mrf.mxu1 }
 0x1c9   :  { %974 = vst.msk [vmem:[%s1767_s5 + $0xa0] sm:$0xff] %vm24_vm0, %v942_v13  ;;  %v945_v18 = vadd.f32 %v1571_v27, %v906_v15  ;;  %875 = vst.msk [vmem:[#allocation2 + $0xd8] sm:$0xff] %vm24_vm0, %v843_v14  ;;  %v842_v19 = vadd.f32 %v787_v16, %v480_v12 }
 0x1ca   :  { %v905_v20 = vld [vmem:[#allocation2 + $0xb0] sm:$0xff]  ;;  %v1248_v21 = vpop.f32.mrf.mxu1 }
 0x1cb   :  { %977 = vst.msk [vmem:[%s1767_s5 + $0xb8] sm:$0xff] %vm24_vm0, %v945_v18  ;;  %v944_v22 = vadd.f32 %v1571_v27, %v905_v20  ;;  %874 = vst.msk [vmem:[#allocation2 + $0xd0] sm:$0xff] %vm24_vm0, %v842_v19  ;;  %v845_v23 = vadd.f32 %v1248_v21, %v483_v17 }
 0x1cc   :  { %v908_v24 = vld [vmem:[#allocation2 + $0xc8] sm:$0xff]  ;;  %v797_v25 = vpop.f32.mrf.mxu1 }
 0x1cd   :  { %976 = vst.msk [vmem:[%s1767_s5 + $0xb0] sm:$0xff] %vm24_vm0, %v944_v22  ;;  %v947_v28 = vadd.f32 %v1571_v27, %v908_v24  ;;  %877 = vst.msk [vmem:[#allocation2 + $0xe8] sm:$0xff] %vm24_vm0, %v845_v23  ;;  %v844_v29 = vadd.f32 %v797_v25, %v482_v45 }
 0x1ce   :  { %v907_v30 = vld [vmem:[#allocation2 + $0xc0] sm:$0xff]  ;;  %v1251_v31 = vpop.f32.mrf.mxu1 }
 0x1cf   :  { %979 = vst.msk [vmem:[%s1767_s5 + $0xc8] sm:$0xff] %vm24_vm0, %v947_v28  ;;  %v946_v33 = vadd.f32 %v1571_v27, %v907_v30  ;;  %876 = vst.msk [vmem:[#allocation2 + $0xe0] sm:$0xff] %vm24_vm0, %v844_v29  ;;  %v847_v34 = vadd.f32 %v1251_v31, %v485_v26 }
 0x1d0   :  { %v910_v35 = vld [vmem:[#allocation2 + $0xd8] sm:$0xff]  ;;  %v807_v36 = vpop.f32.mrf.mxu1 }
 0x1d1   :  { %978 = vst.msk [vmem:[%s1767_s5 + $0xc0] sm:$0xff] %vm24_vm0, %v946_v33  ;;  %v949_v37 = vadd.f32 %v1571_v27, %v910_v35  ;;  %879 = vst.msk [vmem:[#allocation2 + $0xf8] sm:$0xff] %vm24_vm0, %v847_v34  ;;  %v846_v38 = vadd.f32 %v807_v36, %v484_v32 }
 0x1d2   :  { %v909_v39 = vld [vmem:[#allocation2 + $0xd0] sm:$0xff] }
 0x1d3   :  { %981 = vst.msk [vmem:[%s1767_s5 + $0xd8] sm:$0xff] %vm24_vm0, %v949_v37  ;;  %v948_v40 = vadd.f32 %v1571_v27, %v909_v39  ;;  %878 = vst.msk [vmem:[#allocation2 + $0xf0] sm:$0xff] %vm24_vm0, %v846_v38 }
 0x1d4   :  { %v912_v41 = vld [vmem:[#allocation2 + $0xe8] sm:$0xff] }
 0x1d5   :  { %980 = vst.msk [vmem:[%s1767_s5 + $0xd0] sm:$0xff] %vm24_vm0, %v948_v40  ;;  %v951_v42 = vadd.f32 %v1571_v27, %v912_v41 }
 0x1d6   :  { %v911_v43 = vld [vmem:[#allocation2 + $0xe0] sm:$0xff] }
 0x1d7   :  { %983 = vst.msk [vmem:[%s1767_s5 + $0xe8] sm:$0xff] %vm24_vm0, %v951_v42  ;;  %v950_v44 = vadd.f32 %v1571_v27, %v911_v43 }
 0x1d8   :  { %v914_v46 = vld [vmem:[#allocation2 + $0xf8] sm:$0xff] }
 0x1d9   :  { %982 = vst.msk [vmem:[%s1767_s5 + $0xe0] sm:$0xff] %vm24_vm0, %v950_v44  ;;  %v953_v47 = vadd.f32 %v1571_v27, %v914_v46 }
 0x1da   :  { %v913_v48 = vld [vmem:[#allocation2 + $0xf0] sm:$0xff] }
 0x1db   :  { %985 = vst.msk [vmem:[%s1767_s5 + $0xf8] sm:$0xff] %vm24_vm0, %v953_v47  ;;  %v952_v49 = vadd.f32 %v1571_v27, %v913_v48 }
 0x1dd   :  { %984 = vst.msk [vmem:[%s1767_s5 + $0xf0] sm:$0xff] %vm24_vm0, %v952_v49 }

</bundles_post_ra>
